<compile_context>
chip_gen: v7x
topology: tpu7x:2x2x1
jax: 0.10.0
libtpu: 0.0.40
codegen_flags: <defaults>
</compile_context>

<pallas_src>
import jax
import jax.numpy as jnp
from jax.experimental import pallas as pl
from jax.experimental.pallas import tpu as pltpu


def _round_up(v, m):
    return (v + m - 1) // m * m


def linear_kernel(x_ref, w_ref, b_ref, o_ref):
    # x_ref: (TB, D) VMEM tile; w_ref: (1, D) VMEM (resident across the grid);
    # b_ref: (1,) SMEM scalar; o_ref: (1, TB) VMEM lane-dense output row.
    x = x_ref[...].astype(jnp.float32)           # f32 accumulation (PyTorch semantics)
    w = w_ref[...].astype(jnp.float32)
    prod = x * w                                 # VPU elementwise, (1, D) broadcast
    acc = jnp.sum(prod, axis=-1)                 # (TB,) cross-lane reduce (XLU slot)
    out_row = (acc + b_ref[0].astype(jnp.float32)).astype(o_ref.dtype)
    o_ref[...] = out_row[None, :]                # full-width (1, TB) store


def linear_model(x, weight, bias, *, target_tile_bytes=4 * 1024 * 1024):
    """y = x @ W^T + b.  x: (B, D); weight: (1, D) (PyTorch nn.Linear); bias: (1,)."""
    B, D = x.shape
    weight = weight.reshape(1, D)
    bias = bias.reshape(1)
    itemsize = jnp.dtype(x.dtype).itemsize

    # ---- Generation-aware VMEM budget (v5e/v6e: 128 MiB physical, v7x: 64 MiB). ----
    try:
        vmem_cap = int(pltpu.get_tpu_info().vmem_capacity_bytes)
    except Exception:
        vmem_cap = 64 * 1024 * 1024  # conservative (v7x-sized) fallback
    # Budget for the pipelined x window, leaving headroom for weight/output buffers
    # and compiler scratch: ~28 MiB on v7x, ~52 MiB on v5e/v6e.
    x_window_budget = min(vmem_cap // 2, 56 * 1024 * 1024) - 4 * 1024 * 1024

    # ---- Tile-row count TB: sized by bytes, rounded to 128 lanes. ----
    hbm_row_bytes = D * itemsize                       # bytes actually streamed per row
    vmem_row_bytes = _round_up(D, 128) * itemsize      # VMEM rows lane-pad to 128
    tb_target = max(1, target_tile_bytes // hbm_row_bytes)
    max_rows_vmem = max(1, x_window_budget // (2 * vmem_row_bytes))  # double-buffered
    tb = min(tb_target, max_rows_vmem)
    if tb >= 128:
        tb = tb // 128 * 128          # lane-dense (1, TB) output stores
    else:
        tb = max(8, tb // 8 * 8)      # huge-D fallback: sublane-aligned only

    if B <= tb:
        # Whole batch in a single block (block dims == array dims: always legal,
        # even for odd B); lane-density of the output is moot at this size.
        TB, n_tiles = B, 1
    else:
        TB = tb
        n_tiles = pl.cdiv(B, TB)      # last block may be partial: NO jnp.pad; the
                                      # garbage rows only hit outputs >= B (sliced off)

    # Optional deeper input buffering when tiles are small and the grid is long.
    n_buf = 2
    tile_hbm_bytes = TB * hbm_row_bytes
    tile_vmem_bytes = _round_up(TB, 8) * vmem_row_bytes
    if (tile_hbm_bytes < (1 << 20) and n_tiles >= 4
            and 3 * tile_vmem_bytes <= x_window_budget):
        n_buf = 3

    # Scoped-VMEM limit covering the actual footprint (v5e's default is only 16 MiB),
    # capped below the chip's physical capacity.
    need = (n_buf * tile_vmem_bytes
            + 2 * 8 * vmem_row_bytes                       # resident weight row
            + 2 * 8 * _round_up(TB, 128) * itemsize        # output row buffers
            + (2 << 20))                                   # compiler scratch slack
    vmem_limit = int(min(vmem_cap - (8 << 20), max(need, 32 * 1024 * 1024)))

    if n_buf > 2:
        x_spec = pl.BlockSpec((TB, D), lambda i: (i, 0),
                              pipeline_mode=pl.Buffered(n_buf))
    else:
        x_spec = pl.BlockSpec((TB, D), lambda i: (i, 0))

    out = pl.pallas_call(
        linear_kernel,
        out_shape=jax.ShapeDtypeStruct((n_tiles, TB), x.dtype),
        grid=(n_tiles,),
        in_specs=[
            x_spec,                                        # pipelined batch tile
            pl.BlockSpec((1, D), lambda i: (0, 0)),        # weight row, stays resident
            pl.BlockSpec(memory_space=pltpu.MemorySpace.SMEM),  # bias: scalar path
        ],
        # Lane-dense output: one (1, TB) row per grid step.
        out_specs=pl.BlockSpec((1, TB), lambda i: (i, 0)),
        compiler_params=pltpu.CompilerParams(
            # Batch axis is embarrassingly parallel.
            # TODO(synk): on v7x confirm via trace that both TensorCores are engaged;
            # if not, switch this axis to pltpu.CORE_PARALLEL / pl.core_map.
            dimension_semantics=("parallel",),
            vmem_limit_bytes=vmem_limit,
        ),
    )(x, weight, bias)

    # Layout plumbing back to PyTorch's (B, 1); drops any partial-tile garbage rows.
    return out.reshape(n_tiles * TB, 1)[:B]


if __name__ == "__main__":
    key = jax.random.PRNGKey(0)
    k_x, k_w, k_b = jax.random.split(key, 3)

    batch, input_dim = 8, 32

    # Deterministic synthetic parameters with PyTorch nn.Linear(input_dim, 1)
    # shapes: weight (1, input_dim), bias (1,).
    weight = jax.random.uniform(
        k_w, (1, input_dim), dtype=jnp.float32, minval=-1.0, maxval=1.0
    ) / jnp.sqrt(input_dim)
    bias = jax.random.uniform(
        k_b, (1,), dtype=jnp.float32, minval=-1.0, maxval=1.0
    ) / jnp.sqrt(input_dim)

    x = jax.random.normal(k_x, (batch, input_dim), dtype=jnp.float32)

    out = linear_model(x, weight, bias)
    jax.block_until_ready(out)

    # Reference check (PyTorch semantics: x @ W^T + b).
    ref = x @ weight.T + bias
    assert out.shape == (batch, 1)
    assert jnp.allclose(out, ref, atol=1e-5, rtol=1e-5)

    print("KERNEL_OK")
</pallas_src>

<mosaic_0001>
module attributes {stable_mosaic.version = 11 : i64} {
  func.func @linear_kernel(%arg0: i32, %arg1: memref<8x32xf32, #tpu.memory_space<vmem>>, %arg2: memref<1x32xf32, #tpu.memory_space<vmem>>, %arg3: memref<1xf32, #tpu.memory_space<smem>>, %arg4: memref<1x8xf32, #tpu.memory_space<vmem>>) attributes {dimension_semantics = [#tpu.dimension_semantics<parallel>], iteration_bounds = array<i64: 1>, scalar_prefetch = 0 : i64, scratch_operands = 0 : i64, tpu.core_type = #tpu.core_type<tc>, window_params = [{transform_indices = @transform_0, window_bounds = array<i64: 8, 32>}, {pipeline_mode = #tpu.pipeline_mode<synchronous>, transform_indices = @transform_1, window_bounds = array<i64: 1, 32>}, {transform_indices = @transform_2, window_bounds = array<i64: 1>}, {transform_indices = @transform_3, window_bounds = array<i64: 1, 8>}]} {
    %c0 = arith.constant 0 : index
    %c0_0 = arith.constant 0 : index
    %0 = vector.load %arg1[%c0, %c0_0] : memref<8x32xf32, #tpu.memory_space<vmem>>, vector<8x32xf32>
    %c0_1 = arith.constant 0 : index
    %c0_2 = arith.constant 0 : index
    %1 = vector.load %arg2[%c0_1, %c0_2] : memref<1x32xf32, #tpu.memory_space<vmem>>, vector<1x32xf32>
    %2 = vector.broadcast %1 : vector<1x32xf32> to vector<8x32xf32>
    %3 = arith.mulf %0, %2 : vector<8x32xf32>
    %cst = arith.constant dense<0.000000e+00> : vector<8xf32>
    %4 = vector.multi_reduction <add>, %3, %cst [1] : vector<8x32xf32> to vector<8xf32>
    %c0_3 = arith.constant 0 : index
    %5 = memref.load %arg3[%c0_3] : memref<1xf32, #tpu.memory_space<smem>>
    %6 = vector.broadcast %5 : f32 to vector<8xf32>
    %7 = arith.addf %4, %6 : vector<8xf32>
    %8 = vector.shape_cast %7 : vector<8xf32> to vector<1x8xf32>
    %c0_4 = arith.constant 0 : index
    %c0_5 = arith.constant 0 : index
    %9 = vector.load %arg4[%c0_4, %c0_5] : memref<1x8xf32, #tpu.memory_space<vmem>>, vector<1x8xf32>
    tpu.vector_store %arg4[%c0_4, %c0_5], %8 {strides = array<i32>} : memref<1x8xf32, #tpu.memory_space<vmem>>, vector<1x8xf32>,
    return
  }
  func.func @transform_0(%arg0: i32) -> (i32, i32) {
    %c0_i32 = arith.constant 0 : i32
    %c0_i32_0 = arith.constant 0 : i32
    return %arg0, %c0_i32 : i32, i32
  }
  func.func @transform_1(%arg0: i32) -> (i32, i32) {
    %c0_i32 = arith.constant 0 : i32
    %c0_i32_0 = arith.constant 0 : i32
    %c0_i32_1 = arith.constant 0 : i32
    return %c0_i32, %c0_i32_0 : i32, i32
  }
  func.func @transform_2(%arg0: i32) -> i32 {
    %c0_i32 = arith.constant 0 : i32
    %c0_i32_0 = arith.constant 0 : i32
    return %c0_i32 : i32
  }
  func.func @transform_3(%arg0: i32) -> (i32, i32) {
    %c0_i32 = arith.constant 0 : i32
    %c0_i32_0 = arith.constant 0 : i32
    return %arg0, %c0_i32 : i32, i32
  }
}

</mosaic_0001>

<bundles_post_ra>
// kernel: tpu_custom_call.1
= control target key start
LH: loop header
LB: loop body
LE: loop exit
PB: predicated region body
PF: predicated region fallthrough
CT: control target
= control target key end

     0   :  { %9 = vsyncpa [#allocation4], 0  ;;  %s172_s0 = inlined_call_operand.hbm [shape: f32[8,32], index: 0, kind: input, shape index: {}]   ;;  %s173_s1 = inlined_call_operand.vmem [shape: f32[1,32], index: 1, kind: input, shape index: {}]   ;;  %s174_s2 = inlined_call_operand.<no memory space> [shape: f32[1], index: 2, kind: input, shape index: {}]   ;;  %s175_s3 = inlined_call_operand.hbm [shape: f32[1,8], index: 3, kind: output, shape index: {}]  }
   0x1   :  { %10 = vsyncpa [#allocation5], 0  ;;  %s120_s12 = smov [#allocation3]   ;;  %s72_s16 = scalar_lea.hbm %s172_s0, 128 }
   0x2   :  { %s17_s13 = sshll.u32 %s120_s12, 4  ;;  %p73_p0 = scmp.ne.s32.totalorder %s172_s0, %s72_s16  ;;  %s18_s13 = int_to_ptr.vmem [resolvable:$true] %s17_s13 }
   0x3   :  { %p76_p1 = scmp.lt.u32.totalorder %s72_s16, %s172_s0 }
   0x5   :  { %p78_p2 = pnand %p76_p1, %p73_p0 }
   0x7   :  { %81 = shalt.err (!%p78_p2)
}
   0x8   :  { %s82_s21 = scalar_lea.vmem %s18_s13, 128  ;;  %p87_p4 = scmp.lt.s32.totalorder %s18_s13, %s18_s13 }
   0x9   :  { %p83_p3 = scmp.ne.s32.totalorder %s18_s13, %s82_s21  ;;  %p88_p5 = scmp.lt.s32.totalorder %s82_s21, %s82_s21 }
   0xb   :  { %p89_p6 = por %p88_p5, %p87_p4 }
   0xd   :  { %p90_p7 = pnand %p89_p6, %p83_p3 }
   0xf   :  { %93 = shalt.err (!%p90_p7)
}
  0x10   :  { %20 = dma.hbm_to_vmem [thread:$0]  %s172_s0, 128, %s18_s13, [#allocation4]  }
  0x11   :  { %116 = dma.done.wait [#allocation4], 128  }
  0x12   :  { %117 = vsyncadd [#allocation4], 4294967168  ;;  %v28_v0 = vld [vmem:[#allocation3] sm:$0xff]  ;;  %vm37_vm0 = vcmask 261120   ;;  %v45_v4 = vlaneseq  ;;  %v42_v7 = vstv %s174_s2  ;;  %s121_s0 = smov [#allocation6]   ;;  %vm52_vm1 = vcmask 57344  }
  0x13   :  { %v69_v1 = vld [vmem:[%s173_s1] ss:$0 sm:$0xff]  ;;  %s60_s28 = sshll.u32 %s121_s0, 4  ;;  %s61_s28 = int_to_ptr.vmem [resolvable:$true] %s60_s28 }
  0x14   :  { %v36_v2 = vmul.f32 %v69_v1, %v28_v0  ;;  %v46_v5 = vand.u32 127, %v45_v4  ;;  %v48_v6 = vshrl.u32 %v45_v4, 7  ;;  %s94_s1 = scalar_lea.vmem %s61_s28, 16  ;;  %s98_s29 = scalar_lea.vmem %s61_s28, 32 }
  0x15   :  { %p95_p8 = scmp.ne.s32.totalorder %s61_s28, %s94_s1  ;;  %p99_p9 = scmp.lt.s32.totalorder %s61_s28, %s61_s28 }
  0x16   :  { %v38_v3 = vsel %vm37_vm0, %v36_v2, 0.0  ;;  %v49_v8 = vsub.s32 %v46_v5, %v48_v6  ;;  %p100_p10 = scmp.lt.s32.totalorder %s98_s29, %s94_s1 }
  0x17   :  { %39 = vadd.xlane.f32.xlu0 %v38_v3 }
  0x18   :  { %p101_p11 = por %p100_p10, %p99_p9 }
  0x1a   :  { %p102_p12 = pnand %p101_p11, %p95_p8 }
  0xa4   :  { %v40_v9 = vpop.xlane.xlu0 %39 }
  0xa5   :  { %v43_v10 = vadd.f32 %v42_v7, %v40_v9 }
  0xa7   :  { %v50_v11 = vrot.slane %v43_v10, %v49_v8 }
  0xa9   :  { %53 = vst.msk [vmem:[#allocation6] sm:$0x1] %vm52_vm1, %v50_v11 }
  0xaa   :  { %105 = shalt.err (!%p102_p12)
}
  0xab   :  { %s106_s2 = scalar_lea.hbm %s175_s3, 16 }
  0xac   :  { %p107_p13 = scmp.ne.s32.totalorder %s175_s3, %s106_s2  ;;  %p110_p0 = scmp.lt.u32.totalorder %s106_s2, %s175_s3 }
  0xae   :  { %p112_p1 = pnand %p110_p0, %p107_p13 }
  0xb0   :  { %115 = shalt.err (!%p112_p1)
}
  0xb1   :  { %63 = dma.vmem_to_hbm [thread:$0]  %s61_s28, 16, %s175_s3, [#allocation5]  }
  0xb2   :  { %118 = dma.done.wait [#allocation5], 16  }
  0xb3   :  { %119 = vsyncadd [#allocation5], 4294967280 }
  0xb4   :  { %67 = vsyncpa [#allocation4], 1 }
  0xb5   :  { %68 = vsyncpa [#allocation5], 1 }

</bundles_post_ra>
